<compile_context>
chip_gen: v6e
topology: v6e:2x2x1
jax: 0.10.0
libtpu: 0.0.40
codegen_flags: <defaults>
</compile_context>

<pallas_src>
import jax
import jax.numpy as jnp
from jax.experimental import pallas as pl
from jax.experimental.pallas import tpu as pltpu


def _critic_kernel(x_ref, w1_ref, b1_ref, w2_ref, b2_ref, w3p_ref, b3_ref,
                   o_ref):
    # Layer 1: single bf16 MXU matmul (concat folded in the wrapper), f32
    # accumulation; bias + ReLU + bf16 downcast fused into one expression so
    # h1 is materialized once, in bf16.
    h1 = jnp.maximum(
        jnp.dot(x_ref[...], w1_ref[...], preferred_element_type=jnp.float32)
        + b1_ref[...], 0.0).astype(jnp.bfloat16)

    # Layer 2: same fused epilogue.
    h2 = jnp.maximum(
        jnp.dot(h1, w2_ref[...], preferred_element_type=jnp.float32)
        + b2_ref[...], 0.0).astype(jnp.bfloat16)

    # Layer 3 on the MXU: W3 is zero-padded to [H, 128] with column 0 = w3.
    # Slice lane 0 in-kernel; stored output stays [TB, 1].
    y = jnp.dot(h2, w3p_ref[...], preferred_element_type=jnp.float32)
    o_ref[...] = (y[:, 0:1] + b3_ref[0]).astype(o_ref.dtype)


def _round_up(x, m):
    return (x + m - 1) // m * m


def safety_critic_forward(obs, action, params, *, tb_max=2048):
    """obs: [B, obs_dim], action: [B, act_dim] -> [B, 1] (float32)."""
    w1, b1, w2, b2, w3p, b3 = params
    B = obs.shape[0]
    in_dim, H = w1.shape

    # Single wrapper pass: concat + bf16 cast (XLA fuses these); avoids an
    # extra HBM round-trip per input array for this compute-light net.
    x = jnp.concatenate([obs, action], axis=-1).astype(jnp.bfloat16)

    # Batch tiling: balance tiles (bounded padding waste), multiple of 8
    # sublanes, capped at tb_max rows, and aim for an even number of grid
    # steps so the parallel axis shards across both v7x TensorCores.
    n_steps = max(2, pl.cdiv(B, tb_max))
    if n_steps % 2:
        n_steps += 1
    TB = _round_up(pl.cdiv(B, n_steps), 8)
    B_pad = _round_up(B, TB)
    if B_pad != B:
        x = jnp.pad(x, ((0, B_pad - B), (0, 0)))
    grid = (B_pad // TB,)

    const = lambda i: (0, 0)   # weights/biases: same block every grid step

    out = pl.pallas_call(
        _critic_kernel,
        out_shape=jax.ShapeDtypeStruct((B_pad, 1), jnp.float32),
        grid=grid,
        in_specs=[
            pl.BlockSpec((TB, in_dim), lambda i: (i, 0)),      # x tile (bf16)
            pl.BlockSpec((in_dim, H), const),                  # W1 (bf16)
            pl.BlockSpec((1, H), const),                       # b1 (f32)
            pl.BlockSpec((H, H), const),                       # W2 (bf16)
            pl.BlockSpec((1, H), const),                       # b2 (f32)
            pl.BlockSpec((H, 128), const),                     # W3 padded (bf16)
            pl.BlockSpec(memory_space=pltpu.MemorySpace.SMEM), # b3 scalar
        ],
        out_specs=pl.BlockSpec((TB, 1), lambda i: (i, 0)),
        compiler_params=pltpu.CompilerParams(
            dimension_semantics=("parallel",)),
    )(x, w1, b1, w2, b2, w3p, b3)

    return out[:B] if B_pad != B else out


def init_params(key, obs_dim, action_dim, hidden=256):
    """PyTorch-like uniform fan-in init.  Weights stored transposed
    ([in, out]) so the kernel does x @ W; matmul weights in bf16, biases in
    f32; W3 zero-padded to [hidden, 128] (column 0) for the MXU final layer;
    b3 stored as a (1,) f32 scalar for SMEM."""
    d_in = obs_dim + action_dim
    ks = jax.random.split(key, 6)

    def lin(kw, kb, fan_in, fan_out):
        bound = 1.0 / jnp.sqrt(float(fan_in))
        w = jax.random.uniform(kw, (fan_in, fan_out), jnp.float32, -bound, bound)
        b = jax.random.uniform(kb, (1, fan_out), jnp.float32, -bound, bound)
        return w, b

    w1, b1 = lin(ks[0], ks[1], d_in, hidden)
    w2, b2 = lin(ks[2], ks[3], hidden, hidden)
    w3, b3 = lin(ks[4], ks[5], hidden, 1)

    w3_pad = jnp.zeros((hidden, 128), jnp.float32).at[:, 0:1].set(w3)
    return (w1.astype(jnp.bfloat16), b1,
            w2.astype(jnp.bfloat16), b2,
            w3_pad.astype(jnp.bfloat16), b3.reshape(-1))


def reference_forward(obs, action, params):
    """Pure-JAX reference mirroring the kernel's bf16/f32 numerics."""
    w1, b1, w2, b2, w3p, b3 = params
    f32 = lambda a: a.astype(jnp.float32)
    x = jnp.concatenate([obs, action], axis=-1).astype(jnp.bfloat16)
    h1 = jnp.maximum(f32(x) @ f32(w1) + b1, 0.0).astype(jnp.bfloat16)
    h2 = jnp.maximum(f32(h1) @ f32(w2) + b2, 0.0).astype(jnp.bfloat16)
    y = f32(h2) @ f32(w3p)
    return y[:, 0:1] + b3[0]


if __name__ == "__main__":
    obs_dim, action_dim, batch = 12, 4, 8

    key = jax.random.PRNGKey(0)
    k_obs, k_act, k_params = jax.random.split(key, 3)

    obs = jax.random.normal(k_obs, (batch, obs_dim), jnp.float32)
    action = jax.random.normal(k_act, (batch, action_dim), jnp.float32)
    params = init_params(k_params, obs_dim, action_dim)

    out = safety_critic_forward(obs, action, params)
    out = jax.block_until_ready(out)

    ref = reference_forward(obs, action, params)
    assert out.shape == (batch, 1), out.shape
    assert jnp.allclose(out, ref, atol=2e-3, rtol=2e-3), "mismatch vs reference"

    print("KERNEL_OK")
</pallas_src>

<mosaic_0001>
module attributes {stable_mosaic.version = 11 : i64} {
  func.func @_critic_kernel(%arg0: i32, %arg1: memref<8x16xbf16, #tpu.memory_space<vmem>>, %arg2: memref<16x256xbf16, #tpu.memory_space<vmem>>, %arg3: memref<1x256xf32, #tpu.memory_space<vmem>>, %arg4: memref<256x256xbf16, #tpu.memory_space<vmem>>, %arg5: memref<1x256xf32, #tpu.memory_space<vmem>>, %arg6: memref<256x128xbf16, #tpu.memory_space<vmem>>, %arg7: memref<1xf32, #tpu.memory_space<smem>>, %arg8: memref<8x1xf32, #tpu.memory_space<vmem>>) attributes {dimension_semantics = [#tpu.dimension_semantics<parallel>], iteration_bounds = array<i64: 1>, scalar_prefetch = 0 : i64, scratch_operands = 0 : i64, tpu.core_type = #tpu.core_type<tc>, window_params = [{transform_indices = @transform_0, window_bounds = array<i64: 8, 16>}, {pipeline_mode = #tpu.pipeline_mode<synchronous>, transform_indices = @transform_1, window_bounds = array<i64: 16, 256>}, {pipeline_mode = #tpu.pipeline_mode<synchronous>, transform_indices = @transform_2, window_bounds = array<i64: 1, 256>}, {pipeline_mode = #tpu.pipeline_mode<synchronous>, transform_indices = @transform_3, window_bounds = array<i64: 256, 256>}, {pipeline_mode = #tpu.pipeline_mode<synchronous>, transform_indices = @transform_4, window_bounds = array<i64: 1, 256>}, {pipeline_mode = #tpu.pipeline_mode<synchronous>, transform_indices = @transform_5, window_bounds = array<i64: 256, 128>}, {transform_indices = @transform_6, window_bounds = array<i64: 1>}, {transform_indices = @transform_7, window_bounds = array<i64: 8, 1>}]} {
    %c0 = arith.constant 0 : index
    %c0_0 = arith.constant 0 : index
    %0 = vector.load %arg1[%c0, %c0_0] : memref<8x16xbf16, #tpu.memory_space<vmem>>, vector<8x16xbf16>
    %c0_1 = arith.constant 0 : index
    %c0_2 = arith.constant 0 : index
    %1 = vector.load %arg2[%c0_1, %c0_2] : memref<16x256xbf16, #tpu.memory_space<vmem>>, vector<16x256xbf16>
    %cst = arith.constant dense<0.000000e+00> : vector<8x256xf32>
    %2 = tpu.matmul %0, %1, %cst {dimension_numbers = #tpu.dot_dimension_numbers<[1], [0], [0], [1], [0, 0, 1, 1], [], []>} : vector<8x16xbf16>, vector<16x256xbf16>, vector<8x256xf32> -> vector<8x256xf32>
    %c0_3 = arith.constant 0 : index
    %c0_4 = arith.constant 0 : index
    %3 = vector.load %arg3[%c0_3, %c0_4] : memref<1x256xf32, #tpu.memory_space<vmem>>, vector<1x256xf32>
    %4 = vector.broadcast %3 : vector<1x256xf32> to vector<8x256xf32>
    %5 = arith.addf %2, %4 : vector<8x256xf32>
    %cst_5 = arith.constant 0.000000e+00 : f32
    %6 = vector.broadcast %cst_5 : f32 to vector<8x256xf32>
    %7 = arith.maximumf %5, %6 : vector<8x256xf32>
    %8 = arith.truncf %7 : vector<8x256xf32> to vector<8x256xbf16>
    %c0_6 = arith.constant 0 : index
    %c0_7 = arith.constant 0 : index
    %9 = vector.load %arg4[%c0_6, %c0_7] : memref<256x256xbf16, #tpu.memory_space<vmem>>, vector<256x256xbf16>
    %cst_8 = arith.constant dense<0.000000e+00> : vector<8x256xf32>
    %10 = tpu.matmul %8, %9, %cst_8 {dimension_numbers = #tpu.dot_dimension_numbers<[1], [0], [0], [1], [0, 0, 1, 1], [], []>} : vector<8x256xbf16>, vector<256x256xbf16>, vector<8x256xf32> -> vector<8x256xf32>
    %c0_9 = arith.constant 0 : index
    %c0_10 = arith.constant 0 : index
    %11 = vector.load %arg5[%c0_9, %c0_10] : memref<1x256xf32, #tpu.memory_space<vmem>>, vector<1x256xf32>
    %12 = vector.broadcast %11 : vector<1x256xf32> to vector<8x256xf32>
    %13 = arith.addf %10, %12 : vector<8x256xf32>
    %cst_11 = arith.constant 0.000000e+00 : f32
    %14 = vector.broadcast %cst_11 : f32 to vector<8x256xf32>
    %15 = arith.maximumf %13, %14 : vector<8x256xf32>
    %16 = arith.truncf %15 : vector<8x256xf32> to vector<8x256xbf16>
    %c0_12 = arith.constant 0 : index
    %c0_13 = arith.constant 0 : index
    %17 = vector.load %arg6[%c0_12, %c0_13] : memref<256x128xbf16, #tpu.memory_space<vmem>>, vector<256x128xbf16>
    %cst_14 = arith.constant dense<0.000000e+00> : vector<8x128xf32>
    %18 = tpu.matmul %16, %17, %cst_14 {dimension_numbers = #tpu.dot_dimension_numbers<[1], [0], [0], [1], [0, 0, 1, 1], [], []>} : vector<8x256xbf16>, vector<256x128xbf16>, vector<8x128xf32> -> vector<8x128xf32>
    %19 = vector.extract_strided_slice %18 {offsets = [0, 0], sizes = [8, 1], strides = [1, 1]} : vector<8x128xf32> to vector<8x1xf32>
    %c0_15 = arith.constant 0 : index
    %20 = memref.load %arg7[%c0_15] : memref<1xf32, #tpu.memory_space<smem>>
    %21 = vector.broadcast %20 : f32 to vector<8x1xf32>
    %22 = arith.addf %19, %21 : vector<8x1xf32>
    %c0_16 = arith.constant 0 : index
    %c0_17 = arith.constant 0 : index
    %23 = vector.load %arg8[%c0_16, %c0_17] : memref<8x1xf32, #tpu.memory_space<vmem>>, vector<8x1xf32>
    tpu.vector_store %arg8[%c0_16, %c0_17], %22 {strides = array<i32>} : memref<8x1xf32, #tpu.memory_space<vmem>>, vector<8x1xf32>,
    return
  }
  func.func @transform_0(%arg0: i32) -> (i32, i32) {
    %c0_i32 = arith.constant 0 : i32
    %c0_i32_0 = arith.constant 0 : i32
    return %arg0, %c0_i32 : i32, i32
  }
  func.func @transform_1(%arg0: i32) -> (i32, i32) {
    %c0_i32 = arith.constant 0 : i32
    %c0_i32_0 = arith.constant 0 : i32
    %c0_i32_1 = arith.constant 0 : i32
    return %c0_i32, %c0_i32_0 : i32, i32
  }
  func.func @transform_2(%arg0: i32) -> (i32, i32) {
    %c0_i32 = arith.constant 0 : i32
    %c0_i32_0 = arith.constant 0 : i32
    %c0_i32_1 = arith.constant 0 : i32
    return %c0_i32, %c0_i32_0 : i32, i32
  }
  func.func @transform_3(%arg0: i32) -> (i32, i32) {
    %c0_i32 = arith.constant 0 : i32
    %c0_i32_0 = arith.constant 0 : i32
    %c0_i32_1 = arith.constant 0 : i32
    return %c0_i32, %c0_i32_0 : i32, i32
  }
  func.func @transform_4(%arg0: i32) -> (i32, i32) {
    %c0_i32 = arith.constant 0 : i32
    %c0_i32_0 = arith.constant 0 : i32
    %c0_i32_1 = arith.constant 0 : i32
    return %c0_i32, %c0_i32_0 : i32, i32
  }
  func.func @transform_5(%arg0: i32) -> (i32, i32) {
    %c0_i32 = arith.constant 0 : i32
    %c0_i32_0 = arith.constant 0 : i32
    %c0_i32_1 = arith.constant 0 : i32
    return %c0_i32, %c0_i32_0 : i32, i32
  }
  func.func @transform_6(%arg0: i32) -> i32 {
    %c0_i32 = arith.constant 0 : i32
    %c0_i32_0 = arith.constant 0 : i32
    return %c0_i32 : i32
  }
  func.func @transform_7(%arg0: i32) -> (i32, i32) {
    %c0_i32 = arith.constant 0 : i32
    %c0_i32_0 = arith.constant 0 : i32
    return %arg0, %c0_i32 : i32, i32
  }
}

</mosaic_0001>

<bundles_post_ra>
// kernel: tpu_custom_call.1
= control target key start
LH: loop header
LB: loop body
LE: loop exit
PB: predicated region body
PF: predicated region fallthrough
CT: control target
= control target key end

     0   :  { %13 = vsyncpa [#allocation4], 0  ;;  %s892_s0 = inlined_call_operand.hbm [shape: bf16[8,16], index: 0, kind: input, shape index: {}]   ;;  %s893_s1 = inlined_call_operand.hbm [shape: bf16[16,256], index: 1, kind: input, shape index: {}]   ;;  %s894_s2 = inlined_call_operand.vmem [shape: f32[1,256], index: 2, kind: input, shape index: {}]   ;;  %s895_s3 = inlined_call_operand.hbm [shape: bf16[256,256], index: 3, kind: input, shape index: {}]   ;;  %s896_s4 = inlined_call_operand.vmem [shape: f32[1,256], index: 4, kind: input, shape index: {}]   ;;  %s897_s5 = inlined_call_operand.hbm [shape: bf16[256,128], index: 5, kind: input, shape index: {}]   ;;  %s898_s6 = inlined_call_operand.<no memory space> [shape: f32[1], index: 6, kind: input, shape index: {}]   ;;  %s899_s7 = inlined_call_operand.vmem [shape: f32[8,1], index: 7, kind: output, shape index: {}]  }
   0x1   :  { %14 = vsyncpa [#allocation6], 0 }
   0x2   :  { %15 = vsyncpa [#allocation9], 0  ;;  %s819_s24 = smov [#allocation5]  }
   0x3   :  { %s31_s25 = sshll.u32 %s819_s24, 4  ;;  %s32_s25 = int_to_ptr.vmem [resolvable:$true] %s31_s25 }
   0x4   :  { %s741_s26 = scalar_lea.vmem %s32_s25, 256  ;;  %p746_p1 = scmp.lt.s32.totalorder %s32_s25, %s32_s25 }
   0x5   :  { %p742_p0 = scmp.ne.s32.totalorder %s32_s25, %s741_s26  ;;  %p747_p2 = scmp.lt.s32.totalorder %s741_s26, %s741_s26 }
   0x7   :  { %p748_p3 = por %p747_p2, %p746_p1 }
   0x9   :  { %p749_p4 = pnand %p748_p3, %p742_p0 }
   0xb   :  { %752 = shalt.err (!%p749_p4)
}
   0xc   :  { %s820_s27 = smov 128   ;;  %s821_s28 = smov 8  }
   0xd   :  { %37 = dma.hbm_to_vmem [thread:$0]  %s893_s1, 256, %s32_s25, [#allocation6], %s820_s27, %s820_s27, %s821_s28  }
   0xe   :  { %s822_s8 = smov [#allocation3]   ;;  %s823_s10 = smov [#allocation7]  }
   0xf   :  { %s22_s9 = sshll.u32 %s822_s8, 4  ;;  %s45_s11 = sshll.u32 %s823_s10, 4  ;;  %s23_s9 = int_to_ptr.vmem [resolvable:$true] %s22_s9  ;;  %s46_s11 = int_to_ptr.vmem [resolvable:$true] %s45_s11 }
  0x10   :  { %s761_s12 = scalar_lea.vmem %s23_s9, 64  ;;  %p766_p6 = scmp.lt.s32.totalorder %s23_s9, %s23_s9 }
  0x11   :  { %p762_p5 = scmp.ne.s32.totalorder %s23_s9, %s761_s12  ;;  %p767_p7 = scmp.lt.s32.totalorder %s761_s12, %s761_s12 }
  0x13   :  { %p768_p8 = por %p767_p7, %p766_p6 }
  0x15   :  { %p769_p9 = pnand %p768_p8, %p762_p5 }
  0x17   :  { %772 = shalt.err (!%p769_p9)
}
  0x18   :  { %25 = dma.hbm_to_vmem [thread:$0]  %s892_s0, 64, %s23_s9, [#allocation4]  }
  0x19   :  { %s781_s15 = scalar_lea.vmem %s46_s11, 4096  ;;  %p786_p11 = scmp.lt.s32.totalorder %s46_s11, %s46_s11 }
  0x1a   :  { %p782_p10 = scmp.ne.s32.totalorder %s46_s11, %s781_s15  ;;  %p787_p12 = scmp.lt.s32.totalorder %s781_s15, %s781_s15 }
  0x1c   :  { %p788_p13 = por %p787_p12, %p786_p11 }
  0x1e   :  { %p789_p0 = pnand %p788_p13, %p782_p10 }
  0x20   :  { %792 = shalt.err (!%p789_p0)
}
  0x21   :  { %51 = dma.hbm_to_vmem [thread:$0]  %s895_s3, 4096, %s46_s11, [#allocation6], %s820_s27, %s820_s27, %s821_s28  }
  0x22   :  { %s824_s17 = smov [#allocation8]  }
  0x23   :  { %s59_s18 = sshll.u32 %s824_s17, 4  ;;  %s60_s18 = int_to_ptr.vmem [resolvable:$true] %s59_s18 }
  0x24   :  { %s801_s19 = scalar_lea.vmem %s60_s18, 2048  ;;  %p806_p2 = scmp.lt.s32.totalorder %s60_s18, %s60_s18 }
  0x25   :  { %p802_p1 = scmp.ne.s32.totalorder %s60_s18, %s801_s19  ;;  %p807_p3 = scmp.lt.s32.totalorder %s801_s19, %s801_s19 }
  0x27   :  { %p808_p4 = por %p807_p3, %p806_p2 }
  0x29   :  { %p809_p5 = pnand %p808_p4, %p802_p1 }
  0x2b   :  { %812 = shalt.err (!%p809_p5)
}
  0x2c   :  { %s825_s0 = smov 64   ;;  %s826_s20 = smov 4  }
  0x2d   :  { %65 = dma.hbm_to_vmem [thread:$0]  %s897_s5, 2048, %s60_s18, [#allocation9], %s825_s0, %s825_s0, %s826_s20  }
  0x2e   :  { %813 = dma.done.wait [#allocation4], 64  }
  0x2f   :  { %814 = vsyncadd [#allocation4], 4294967232 }
  0x30   :  { %815 = dma.done.wait [#allocation6], 4352  }
  0x31   :  { %816 = vsyncadd [#allocation6], 4294962944 }
  0x32   :  { %817 = dma.done.wait [#allocation9], 2048  }
  0x33   :  { %818 = vsyncadd [#allocation9], 4294965248  ;;  %v827_v0 = vmov 0   ;;  %v666_v1 = vld [vmem:[#allocation5 + $0x4] ss:$8 sps:$4 sm:$0xff]   ;;  %vm106_vm0 = vcmask 130048   ;;  %v86_v48 = vlaneseq }
  0x34   :  { %142 = vmatprep.mubr.bf16.mxu0 %v827_v0  ;;  %v668_v2 = vld [vmem:[#allocation5] ss:$8 sps:$4 sm:$0xff]   ;;  %v81_v3 = vld [vmem:[#allocation3] sm:$0xf]  ;;  %124 = vmatprep.subr.bf16.mxu0 %v666_v1  ;;  %v669_v4 = vld [vmem:[#allocation7 + $0x74] ss:$8 sps:$4 sm:$0xff]  }
  0x35   :  { %v671_v5 = vld [vmem:[#allocation7 + $0x70] ss:$8 sps:$4 sm:$0xff]   ;;  %125 = vmatpush1.bf16.msra.mxu0 %v668_v2  ;;  %v672_v6 = vld [vmem:[#allocation7 + $0x64] ss:$8 sps:$4 sm:$0xff]   ;;  %359 = vmatprep.subr.bf16.mxu1 %v669_v4  ;;  %v674_v7 = vld [vmem:[#allocation7 + $0x60] ss:$8 sps:$4 sm:$0xff]  }
  0x36   :  { %360 = vmatpush1.bf16.msra.mxu1 %v671_v5  ;;  %v675_v8 = vld [vmem:[#allocation7 + $0x54] ss:$8 sps:$4 sm:$0xff]   ;;  %v677_v9 = vld [vmem:[#allocation7 + $0x50] ss:$8 sps:$4 sm:$0xff]   ;;  %v678_v10 = vld [vmem:[#allocation7 + $0x44] ss:$8 sps:$4 sm:$0xff]  }
  0x37   :  { %361 = vmatprep.subr.bf16.mxu1 %v672_v6  ;;  %v680_v11 = vld [vmem:[#allocation7 + $0x40] ss:$8 sps:$4 sm:$0xff]   ;;  %v681_v12 = vld [vmem:[#allocation7 + $0x34] ss:$8 sps:$4 sm:$0xff]   ;;  %v683_v13 = vld [vmem:[#allocation7 + $0x30] ss:$8 sps:$4 sm:$0xff]  }
  0x38   :  { %586 = vmatmul.mubr.msk.bf16.vlgmr.msra.gmra.mxu0 %vm106_vm0, %v81_v3  ;;  %v684_v14 = vld [vmem:[#allocation7 + $0x24] ss:$8 sps:$4 sm:$0xff]   ;;  %v686_v15 = vld [vmem:[#allocation7 + $0x20] ss:$8 sps:$4 sm:$0xff]   ;;  %v687_v16 = vld [vmem:[#allocation7 + $0x14] ss:$8 sps:$4 sm:$0xff]  }
  0x39   :  { %v689_v17 = vld [vmem:[#allocation7 + $0x10] ss:$8 sps:$4 sm:$0xff]   ;;  %v690_v18 = vld [vmem:[#allocation7 + $0x4] ss:$8 sps:$4 sm:$0xff]   ;;  %v692_v19 = vld [vmem:[#allocation7] ss:$8 sps:$4 sm:$0xff]  }
  0x3a   :  { %362 = vmatpush1.bf16.msra.mxu1 %v674_v7  ;;  %v693_v20 = vld [vmem:[#allocation7 + $0xf4] ss:$8 sps:$4 sm:$0xff]   ;;  %v695_v21 = vld [vmem:[#allocation7 + $0xf0] ss:$8 sps:$4 sm:$0xff]   ;;  %v696_v22 = vld [vmem:[#allocation7 + $0xe4] ss:$8 sps:$4 sm:$0xff]  }
  0x3b   :  { %363 = vmatprep.subr.bf16.mxu1 %v675_v8  ;;  %v698_v23 = vld [vmem:[#allocation7 + $0xe0] ss:$8 sps:$4 sm:$0xff]   ;;  %v699_v24 = vld [vmem:[#allocation7 + $0xd4] ss:$8 sps:$4 sm:$0xff]   ;;  %v701_v25 = vld [vmem:[#allocation7 + $0xd0] ss:$8 sps:$4 sm:$0xff]  }
  0x3c   :  { %v702_v26 = vld [vmem:[#allocation7 + $0xc4] ss:$8 sps:$4 sm:$0xff]   ;;  %v704_v27 = vld [vmem:[#allocation7 + $0xc0] ss:$8 sps:$4 sm:$0xff]   ;;  %v705_v28 = vld [vmem:[#allocation7 + $0xb4] ss:$8 sps:$4 sm:$0xff]  }
  0x3d   :  { %v707_v29 = vld [vmem:[#allocation7 + $0xb0] ss:$8 sps:$4 sm:$0xff]   ;;  %v708_v30 = vld [vmem:[#allocation7 + $0xa4] ss:$8 sps:$4 sm:$0xff]   ;;  %v710_v31 = vld [vmem:[#allocation7 + $0xa0] ss:$8 sps:$4 sm:$0xff]  }
  0x3e   :  { %364 = vmatpush1.bf16.msra.mxu1 %v677_v9  ;;  %v711_v32 = vld [vmem:[#allocation7 + $0x94] ss:$8 sps:$4 sm:$0xff]   ;;  %v713_v33 = vld [vmem:[#allocation7 + $0x90] ss:$8 sps:$4 sm:$0xff]   ;;  %v714_v34 = vld [vmem:[#allocation7 + $0x84] ss:$8 sps:$4 sm:$0xff]  }
  0x3f   :  { %365 = vmatprep.subr.bf16.mxu1 %v678_v10  ;;  %v716_v35 = vld [vmem:[#allocation7 + $0x80] ss:$8 sps:$4 sm:$0xff]   ;;  %v717_v36 = vld [vmem:[#allocation8 + $0x78] sm:$0xff]   ;;  %v719_v38 = vld [vmem:[#allocation8 + $0x70] sm:$0xff]   ;;  %v87_v49 = vshrl.u32 %v86_v48, 7  ;;  %vm575_vm1 = vcmask 7168  }
  0x40   :  { %v718_v37 = vld [vmem:[#allocation8 + $0x38] sm:$0xff]   ;;  %635 = vmatprep.subr.bf16.mxu0 %v717_v36  ;;  %v720_v39 = vld [vmem:[#allocation8 + $0x30] sm:$0xff]   ;;  %v721_v40 = vld [vmem:[#allocation8 + $0x68] sm:$0xff]  }
  0x41   :  { %636 = vmatpush3.bf16.msra.mxu0 %v718_v37  ;;  %v722_v41 = vld [vmem:[#allocation8 + $0x28] sm:$0xff]   ;;  %v723_v42 = vld [vmem:[#allocation8 + $0x60] sm:$0xff]   ;;  %v725_v44 = vld [vmem:[#allocation8 + $0x58] sm:$0xff]   ;;  %v88_v50 = vsub.s32 0, %v87_v49  ;;  %v92_v52 = vsub.s32 1, %v87_v49 }
  0x42   :  { %366 = vmatpush1.bf16.msra.mxu1 %v680_v11  ;;  %637 = vmatprep.subr.bf16.mxu0 %v719_v38  ;;  %v724_v43 = vld [vmem:[#allocation8 + $0x20] sm:$0xff]   ;;  %v726_v45 = vld [vmem:[#allocation8 + $0x18] sm:$0xff]   ;;  %v727_v46 = vld [vmem:[#allocation8 + $0x50] sm:$0xff]  }
  0x43   :  { %367 = vmatprep.subr.bf16.mxu1 %v681_v12  ;;  %v728_v47 = vld [vmem:[#allocation8 + $0x10] sm:$0xff]   ;;  %v84_v51 = vld [vmem:[%s894_s2] sm:$0x3]  ;;  %v731_v3 = vld [vmem:[#allocation8 + $0x40] sm:$0xff]  }
  0x44   :  { %v89_v53 = vrot.slane %v84_v51, %v88_v50  ;;  %v93_v54 = vrot.slane %v84_v51, %v92_v52  ;;  %v729_v1 = vld [vmem:[#allocation8 + $0x48] sm:$0xff]   ;;  %v732_v4 = vld [vmem:[#allocation8] sm:$0xff]  }
  0x45   :  { %638 = vmatpush3.bf16.msra.mxu0 %v720_v39  ;;  %v730_v2 = vld [vmem:[#allocation8 + $0x8] sm:$0xff]  }
  0x46   :  { %368 = vmatpush1.bf16.msra.mxu1 %v683_v13  ;;  %639 = vmatprep.subr.bf16.mxu0 %v721_v40  ;;  %v187_v5 = vld [vmem:[%s896_s4] sm:$0x3] }
  0x47   :  { %369 = vmatprep.subr.bf16.mxu1 %v684_v14  ;;  %v192_v6 = vrot.slane %v187_v5, %v88_v50  ;;  %v196_v7 = vrot.slane %v187_v5, %v92_v52 }
  0x49   :  { %640 = vmatpush3.bf16.msra.mxu0 %v722_v41 }
  0x4a   :  { %370 = vmatpush1.bf16.msra.mxu1 %v686_v15  ;;  %641 = vmatprep.subr.bf16.mxu0 %v723_v42 }
  0x4b   :  { %371 = vmatprep.subr.bf16.mxu1 %v687_v16 }
  0x4d   :  { %642 = vmatpush3.bf16.msra.mxu0 %v724_v43 }
  0x4e   :  { %372 = vmatpush1.bf16.msra.mxu1 %v689_v17  ;;  %643 = vmatprep.subr.bf16.mxu0 %v725_v44 }
  0x4f   :  { %373 = vmatprep.subr.bf16.mxu1 %v690_v18 }
  0x51   :  { %644 = vmatpush3.bf16.msra.mxu0 %v726_v45 }
  0x52   :  { %374 = vmatpush1.bf16.msra.mxu1 %v692_v19  ;;  %645 = vmatprep.subr.bf16.mxu0 %v727_v46 }
  0x53   :  { %375 = vmatprep.subr.bf16.mxu1 %v693_v20  ;;  %v573_v20 = vstv %s898_s6 }
  0x55   :  { %646 = vmatpush3.bf16.msra.mxu0 %v728_v47 }
  0x56   :  { %376 = vmatpush2.bf16.msra.mxu1 %v695_v21  ;;  %647 = vmatprep.subr.bf16.mxu0 %v729_v1 }
  0x57   :  { %377 = vmatprep.subr.bf16.mxu1 %v696_v22 }
  0x59   :  { %648 = vmatpush3.bf16.msra.mxu0 %v730_v2 }
  0x5a   :  { %378 = vmatpush2.bf16.msra.mxu1 %v698_v23  ;;  %649 = vmatprep.subr.bf16.mxu0 %v731_v3 }
  0x5b   :  { %379 = vmatprep.subr.bf16.mxu1 %v699_v24 }
  0x5d   :  { %650 = vmatpush3.bf16.msra.mxu0 %v732_v4 }
  0x5e   :  { %380 = vmatpush2.bf16.msra.mxu1 %v701_v25 }
  0x5f   :  { %381 = vmatprep.subr.bf16.mxu1 %v702_v26 }
  0x62   :  { %382 = vmatpush2.bf16.msra.mxu1 %v704_v27 }
  0x63   :  { %383 = vmatprep.subr.bf16.mxu1 %v705_v28 }
  0x66   :  { %384 = vmatpush2.bf16.msra.mxu1 %v707_v29 }
  0x67   :  { %385 = vmatprep.subr.bf16.mxu1 %v708_v30 }
  0x6a   :  { %386 = vmatpush2.bf16.msra.mxu1 %v710_v31 }
  0x6b   :  { %387 = vmatprep.subr.bf16.mxu1 %v711_v32 }
  0x6e   :  { %388 = vmatpush2.bf16.msra.mxu1 %v713_v33 }
  0x6f   :  { %389 = vmatprep.subr.bf16.mxu1 %v714_v34 }
  0x72   :  { %390 = vmatpush2.bf16.msra.mxu1 %v716_v35 }
  0xf8   :  { %v144_v55 = vpop.f32.mrf.mxu0 }
  0xf9   :  { %v145_v56 = vadd.f32 %v144_v55, %v89_v53 }
  0xfa   :  { %v146_v57 = vpop.f32.mrf.mxu0 }
  0xfb   :  { %v147_v58 = vadd.f32 %v146_v57, %v93_v54  ;;  %v151_v59 = vmax.f32 %v145_v56, 0.0 }
  0xfc   :  { %v148_v60 = vpop.f32.mrf.mxu0 }
  0xfd   :  { %v152_v61 = vmax.f32 %v147_v58, 0.0  ;;  %v153_v0 = vpack.c.bf16 %v151_v59, %v151_v59 }
  0xfe   :  { %v149_v62 = vpop.f32.mrf.mxu0 }
  0xff   :  { %v154_v63 = vpack.c.bf16 %v152_v61, %v152_v61 }
 0x101   :  { %391 = vmatprep.mubr.bf16.mxu1 %v154_v63 }
 0x102   :  { %392 = vmatmul.mubr.bf16.vlgmr.msra.gmra.mxu1 %v153_v0 }
 0x1c2   :  { %v393_v8 = vpop.f32.mrf.mxu1 }
 0x1c3   :  { %v394_v9 = vadd.f32 %v393_v8, %v192_v6 }
 0x1c4   :  { %v395_v10 = vpop.f32.mrf.mxu1 }
 0x1c5   :  { %v396_v11 = vadd.f32 %v395_v10, %v196_v7  ;;  %v400_v12 = vmax.f32 %v394_v9, 0.0 }
 0x1c6   :  { %v397_v13 = vpop.f32.mrf.mxu1 }
 0x1c7   :  { %v401_v14 = vmax.f32 %v396_v11, 0.0  ;;  %v402_v17 = vpack.c.bf16 %v400_v12, %v400_v12 }
 0x1c8   :  { %v398_v15 = vpop.f32.mrf.mxu1 }
 0x1c9   :  { %v403_v16 = vpack.c.bf16 %v401_v14, %v401_v14 }
 0x1cb   :  { %564 = vmatprep.mubr.bf16.mxu0 %v403_v16 }
 0x1cc   :  { %565 = vmatmul.mubr.bf16.vlgmr.msra.gmra.mxu0 %v402_v17 }
 0x28c   :  { %v651_v18 = vpop.f32.mrf.mxu0 }
 0x28e   :  { %v652_v19 = vpop.f32.mrf.mxu0 }
 0x28f   :  { %v653_v21 = vadd.f32 %v652_v19, %v651_v18 }
 0x290   :  { %v654_v22 = vpop.f32.mrf.mxu0 }
 0x291   :  { %v574_v23 = vadd.f32 %v653_v21, %v573_v20 }
 0x292   :  { %v655_v24 = vpop.f32.mrf.mxu0 }
 0x293   :  { %576 = vst.msk [vmem:[%s899_s7] sm:$0xff] %vm575_vm1, %v574_v23 }
 0x294   :  { %581 = vsyncpa [#allocation4], 1 }
 0x295   :  { %582 = vsyncpa [#allocation6], 1 }
 0x296   :  { %583 = vsyncpa [#allocation9], 1 }

</bundles_post_ra>
